<compile_context>
chip_gen: v5e
topology: v5e:2x2
jax: 0.10.0
libtpu: 0.0.40
codegen_flags: <defaults>
</compile_context>

<pallas_src>
import jax
import jax.numpy as jnp
from jax.experimental import pallas as pl
from jax.experimental.pallas import tpu as pltpu


# ----------------------------------------------------------------------------
# Static layout helpers
# ----------------------------------------------------------------------------
def _round_up(n: int, m: int) -> int:
    return ((n + m - 1) // m) * m


def _slab_layout(state_dim: int, goal_dim: int, action_dim: int, h2: int):
    """Row offsets of each weight segment inside the packed bf16 slab.

    Every segment starts on a 16-row boundary (bf16 sublane packing), so all
    in-kernel static slices begin on a packed-tile boundary.
    """
    off_x = 0
    off_g = off_x + _round_up(state_dim, 16)
    off_u = off_g + _round_up(goal_dim, 16)
    off_w2 = off_u + _round_up(action_dim, 16)
    off_w3 = off_w2 + _round_up(h2, 16)
    total = off_w3 + _round_up(h2, 16)
    return off_x, off_g, off_u, off_w2, off_w3, total


# ----------------------------------------------------------------------------
# One-time parameter packing (at init / after optimizer steps, NOT per call)
# ----------------------------------------------------------------------------
def pack_params(params, state_dim, goal_dim, action_dim, tb=128):
    f32 = lambda a: jnp.asarray(a, jnp.float32)
    H = params["l1.weight"].shape[0]
    h2 = 2 * H
    assert h2 <= 128, ("block-diagonal twin-head packing assumes 2*hidden <= 128 "
                       "(v5e MXU width); split per-head beyond that")
    assert tb % 8 == 0

    off_x, off_g, off_u, off_w2, off_w3, total = _slab_layout(
        state_dim, goal_dim, action_dim, h2)

    # Layer 1, both heads packed along the lane axis: (D, 2H).
    w1 = jnp.concatenate([f32(params["l1.weight"]).T,
                          f32(params["l4.weight"]).T], axis=1)
    # Layer 2, block-diagonal: (2H, 2H).
    zHH = jnp.zeros((H, H), jnp.float32)
    w2 = jnp.block([[f32(params["l2.weight"]).T, zHH],
                    [zHH, f32(params["l5.weight"]).T]])
    # Layer 3, block-diagonal, zero-padded to 2H output lanes: (2H, 2H);
    # only columns 0 (q1) and 1 (q2) are non-zero.
    w3 = jnp.zeros((h2, h2), jnp.float32)
    w3 = w3.at[:H, 0].set(f32(params["l3.weight"])[0])
    w3 = w3.at[H:, 1].set(f32(params["l6.weight"])[0])

    # Single weight slab (zero rows between segments contribute nothing).
    slab = jnp.zeros((total, h2), jnp.float32)
    slab = slab.at[off_x:off_x + state_dim].set(w1[:state_dim])
    slab = slab.at[off_g:off_g + goal_dim].set(w1[state_dim:state_dim + goal_dim])
    slab = slab.at[off_u:off_u + action_dim].set(w1[state_dim + goal_dim:])
    slab = slab.at[off_w2:off_w2 + h2].set(w2)
    slab = slab.at[off_w3:off_w3 + h2].set(w3)

    # Bias rows (layer1 | layer2 | layer3), pre-broadcast to the batch tile so
    # the kernel performs exact-shape f32 adds.
    b = jnp.zeros((3, h2), jnp.float32)
    b = b.at[0, :H].set(f32(params["l1.bias"])).at[0, H:].set(f32(params["l4.bias"]))
    b = b.at[1, :H].set(f32(params["l2.bias"])).at[1, H:].set(f32(params["l5.bias"]))
    b = b.at[2, 0].set(f32(params["l3.bias"])[0]).at[2, 1].set(f32(params["l6.bias"])[0])
    b_slab = jnp.broadcast_to(b[:, None, :], (3, tb, h2)).reshape(3 * tb, h2)

    return {"w": slab.astype(jnp.bfloat16), "b": b_slab}


# ----------------------------------------------------------------------------
# Pallas kernel: fused twin-Q critic forward on one batch tile
# ----------------------------------------------------------------------------
def _make_kernel(sd, gd, ad, h2, tb, tbp, off_x, off_g, off_u, off_w2, off_w3):
    f32 = jnp.float32
    bf16 = jnp.bfloat16

    def kernel(x_ref, g_ref, u_ref, w_ref, b_ref, q_ref):
        # Layer 1 (both heads on the lane axis). xu = cat(x, g, u) is never
        # materialized: the packed W1 was pre-split by input chunk.
        h = jnp.dot(x_ref[...], w_ref[off_x:off_x + sd, :], preferred_element_type=f32)
        h = h + jnp.dot(g_ref[...], w_ref[off_g:off_g + gd, :], preferred_element_type=f32)
        h = h + jnp.dot(u_ref[...], w_ref[off_u:off_u + ad, :], preferred_element_type=f32)
        h = jnp.maximum(h + b_ref[0:tb, :], 0.0)                          # (tb, 2H) f32

        # Layer 2: block-diagonal (2H, 2H); bf16 operands, f32 accumulate.
        h = jnp.dot(h.astype(bf16), w_ref[off_w2:off_w2 + h2, :], preferred_element_type=f32)
        h = jnp.maximum(h + b_ref[tbp:tbp + tb, :], 0.0)                  # (tb, 2H) f32

        # Layer 3: block-diagonal (2H, 2H) with only lanes 0/1 non-zero.
        q = jnp.dot(h.astype(bf16), w_ref[off_w3:off_w3 + h2, :], preferred_element_type=f32)
        q = q + b_ref[2 * tbp:2 * tbp + tb, :]
        q_ref[...] = q[:, 0:2]                                            # [q1 | q2]

    return kernel


# ----------------------------------------------------------------------------
# Wrapper (equivalent of ManagerCritic.forward(x, g, u) -> (q1, q2))
# ----------------------------------------------------------------------------
def manager_critic_forward(x, g, u, packed):
    B, sd = x.shape
    gd, ad = g.shape[1], u.shape[1]
    h2 = packed["w"].shape[1]
    tbp = packed["b"].shape[0] // 3                 # batch tile the biases were packed for
    off_x, off_g, off_u, off_w2, off_w3, total = _slab_layout(sd, gd, ad, h2)
    assert packed["w"].shape[0] == total

    tb = min(tbp, _round_up(B, 8))                  # runtime batch tile (<= packed tile)
    Bp = _round_up(B, tb)
    if Bp != B:
        pad = ((0, Bp - B), (0, 0))
        x, g, u = jnp.pad(x, pad), jnp.pad(g, pad), jnp.pad(u, pad)

    kernel = _make_kernel(sd, gd, ad, h2, tb, tbp, off_x, off_g, off_u, off_w2, off_w3)

    d_in = sd + gd + ad
    cost = pl.CostEstimate(
        flops=2 * Bp * (d_in * h2 + h2 * h2 + h2 * h2),
        bytes_accessed=Bp * d_in * 2 + total * h2 * 2 + 3 * tbp * h2 * 4 + Bp * 2 * 4,
        transcendentals=0)

    resident = lambda i: (0, 0)                     # weights/biases DMA'd once, stay in VMEM
    q = pl.pallas_call(
        kernel,
        out_shape=jax.ShapeDtypeStruct((Bp, 2), jnp.float32),
        grid=(pl.cdiv(Bp, tb),),
        in_specs=[
            pl.BlockSpec((tb, sd), lambda i: (i, 0)),
            pl.BlockSpec((tb, gd), lambda i: (i, 0)),
            pl.BlockSpec((tb, ad), lambda i: (i, 0)),
            pl.BlockSpec((total, h2), resident),
            pl.BlockSpec((3 * tbp, h2), resident),
        ],
        out_specs=pl.BlockSpec((tb, 2), lambda i: (i, 0)),
        compiler_params=pltpu.CompilerParams(dimension_semantics=("parallel",)),
        cost_estimate=cost,
    )(x.astype(jnp.bfloat16), g.astype(jnp.bfloat16), u.astype(jnp.bfloat16),
      packed["w"], packed["b"])

    q = q[:B]
    return q[:, 0:1], q[:, 1:2]


def manager_critic_Q1(x, g, u, packed):
    q1, _ = manager_critic_forward(x, g, u, packed)
    return q1


manager_critic_forward_jit = jax.jit(manager_critic_forward)


# ----------------------------------------------------------------------------
# Deterministic parameter initialization (PyTorch-Linear-style uniform init)
# ----------------------------------------------------------------------------
def init_params(key, state_dim, goal_dim, action_dim, hidden_size=20):
    in_dim = state_dim + goal_dim + action_dim
    layer_shapes = {
        "l1": (hidden_size, in_dim),
        "l2": (hidden_size, hidden_size),
        "l3": (1, hidden_size),
        "l4": (hidden_size, in_dim),
        "l5": (hidden_size, hidden_size),
        "l6": (1, hidden_size),
    }
    params = {}
    for name, (fan_out, fan_in) in layer_shapes.items():
        key, kw, kb = jax.random.split(key, 3)
        bound = 1.0 / jnp.sqrt(jnp.float32(fan_in))
        params[f"{name}.weight"] = jax.random.uniform(
            kw, (fan_out, fan_in), jnp.float32, -bound, bound)
        params[f"{name}.bias"] = jax.random.uniform(
            kb, (fan_out,), jnp.float32, -bound, bound)
    return params


# ----------------------------------------------------------------------------
# Pure-JAX references
# ----------------------------------------------------------------------------
def _reference(x, g, u, params):
    """Exact f32 reference (PyTorch semantics)."""
    xu = jnp.concatenate([x, g, u], axis=1)

    def lin(h, i):
        return h @ params[f"l{i}.weight"].T + params[f"l{i}.bias"]

    h1 = jax.nn.relu(lin(xu, 1)); h1 = jax.nn.relu(lin(h1, 2)); q1 = lin(h1, 3)
    h2 = jax.nn.relu(lin(xu, 4)); h2 = jax.nn.relu(lin(h2, 5)); q2 = lin(h2, 6)
    return q1, q2


def _reference_bf16(x, g, u, params):
    """Reference mirroring the kernel's dtype flow: bf16 operands, f32 accum/bias/ReLU."""
    def lin(h, i):
        w = params[f"l{i}.weight"].astype(jnp.bfloat16)
        return (jnp.dot(h.astype(jnp.bfloat16), w.T, preferred_element_type=jnp.float32)
                + params[f"l{i}.bias"])

    xu = jnp.concatenate([x, g, u], axis=1)
    h1 = jax.nn.relu(lin(xu, 1)); h1 = jax.nn.relu(lin(h1, 2)); q1 = lin(h1, 3)
    h2 = jax.nn.relu(lin(xu, 4)); h2 = jax.nn.relu(lin(h2, 5)); q2 = lin(h2, 6)
    return q1, q2


if __name__ == "__main__":
    state_dim, goal_dim, action_dim = 6, 3, 3
    batch = 256                      # replay-buffer-sized batch -> grid of 2 x 128-row tiles

    key = jax.random.PRNGKey(0)
    kp, kx, kg, ku = jax.random.split(key, 4)

    params = init_params(kp, state_dim, goal_dim, action_dim)
    packed = pack_params(params, state_dim, goal_dim, action_dim, tb=128)

    x = jax.random.normal(kx, (batch, state_dim), jnp.float32)
    g = jax.random.normal(kg, (batch, goal_dim), jnp.float32)
    u = jax.random.normal(ku, (batch, action_dim), jnp.float32)

    q1, q2 = manager_critic_forward_jit(x, g, u, packed)
    q1 = jax.block_until_ready(q1)
    q2 = jax.block_until_ready(q2)
    assert q1.shape == (batch, 1) and q2.shape == (batch, 1)

    # Tight check against a reference with identical bf16 operand rounding.
    m1, m2 = _reference_bf16(x, g, u, params)
    assert jnp.allclose(q1, m1, atol=5e-3, rtol=5e-3)
    assert jnp.allclose(q2, m2, atol=5e-3, rtol=5e-3)

    # Loose check against the exact f32 PyTorch-semantics reference (gap is the
    # bf16 operand rounding only; accumulation is f32).
    r1, r2 = _reference(x, g, u, params)
    assert jnp.allclose(q1, r1, atol=1e-1, rtol=1e-1)
    assert jnp.allclose(q2, r2, atol=1e-1, rtol=1e-1)

    print("KERNEL_OK")
</pallas_src>

<mosaic_0001>
module attributes {stable_mosaic.version = 11 : i64} {
  func.func @kernel(%arg0: i32, %arg1: memref<128x6xbf16, #tpu.memory_space<vmem>>, %arg2: memref<128x3xbf16, #tpu.memory_space<vmem>>, %arg3: memref<128x3xbf16, #tpu.memory_space<vmem>>, %arg4: memref<144x40xbf16, #tpu.memory_space<vmem>>, %arg5: memref<384x40xf32, #tpu.memory_space<vmem>>, %arg6: memref<128x2xf32, #tpu.memory_space<vmem>>) attributes {dimension_semantics = [#tpu.dimension_semantics<parallel>], iteration_bounds = array<i64: 2>, scalar_prefetch = 0 : i64, scratch_operands = 0 : i64, tpu.core_type = #tpu.core_type<tc>, window_params = [{transform_indices = @transform_0, window_bounds = array<i64: 128, 6>}, {transform_indices = @transform_1, window_bounds = array<i64: 128, 3>}, {transform_indices = @transform_2, window_bounds = array<i64: 128, 3>}, {pipeline_mode = #tpu.pipeline_mode<synchronous>, transform_indices = @transform_3, window_bounds = array<i64: 144, 40>}, {pipeline_mode = #tpu.pipeline_mode<synchronous>, transform_indices = @transform_4, window_bounds = array<i64: 384, 40>}, {transform_indices = @transform_5, window_bounds = array<i64: 128, 2>}]} {
    %c0 = arith.constant 0 : index
    %c0_0 = arith.constant 0 : index
    %0 = vector.load %arg1[%c0, %c0_0] : memref<128x6xbf16, #tpu.memory_space<vmem>>, vector<128x6xbf16>
    %c0_1 = arith.constant 0 : index
    %c0_2 = arith.constant 0 : index
    %1 = vector.load %arg4[%c0_1, %c0_2] : memref<144x40xbf16, #tpu.memory_space<vmem>>, vector<6x40xbf16>
    %cst = arith.constant dense<0.000000e+00> : vector<128x40xf32>
    %2 = tpu.matmul %0, %1, %cst {dimension_numbers = #tpu.dot_dimension_numbers<[1], [0], [0], [1], [0, 0, 1, 1], [], []>} : vector<128x6xbf16>, vector<6x40xbf16>, vector<128x40xf32> -> vector<128x40xf32>
    %c0_3 = arith.constant 0 : index
    %c0_4 = arith.constant 0 : index
    %3 = vector.load %arg2[%c0_3, %c0_4] : memref<128x3xbf16, #tpu.memory_space<vmem>>, vector<128x3xbf16>
    %c16 = arith.constant 16 : index
    %c0_5 = arith.constant 0 : index
    %4 = vector.load %arg4[%c16, %c0_5] : memref<144x40xbf16, #tpu.memory_space<vmem>>, vector<3x40xbf16>
    %cst_6 = arith.constant dense<0.000000e+00> : vector<128x40xf32>
    %5 = tpu.matmul %3, %4, %cst_6 {dimension_numbers = #tpu.dot_dimension_numbers<[1], [0], [0], [1], [0, 0, 1, 1], [], []>} : vector<128x3xbf16>, vector<3x40xbf16>, vector<128x40xf32> -> vector<128x40xf32>
    %6 = arith.addf %2, %5 : vector<128x40xf32>
    %c0_7 = arith.constant 0 : index
    %c0_8 = arith.constant 0 : index
    %7 = vector.load %arg3[%c0_7, %c0_8] : memref<128x3xbf16, #tpu.memory_space<vmem>>, vector<128x3xbf16>
    %c32 = arith.constant 32 : index
    %c0_9 = arith.constant 0 : index
    %8 = vector.load %arg4[%c32, %c0_9] : memref<144x40xbf16, #tpu.memory_space<vmem>>, vector<3x40xbf16>
    %cst_10 = arith.constant dense<0.000000e+00> : vector<128x40xf32>
    %9 = tpu.matmul %7, %8, %cst_10 {dimension_numbers = #tpu.dot_dimension_numbers<[1], [0], [0], [1], [0, 0, 1, 1], [], []>} : vector<128x3xbf16>, vector<3x40xbf16>, vector<128x40xf32> -> vector<128x40xf32>
    %10 = arith.addf %6, %9 : vector<128x40xf32>
    %c0_11 = arith.constant 0 : index
    %c0_12 = arith.constant 0 : index
    %11 = vector.load %arg5[%c0_11, %c0_12] : memref<384x40xf32, #tpu.memory_space<vmem>>, vector<128x40xf32>
    %12 = arith.addf %10, %11 : vector<128x40xf32>
    %cst_13 = arith.constant 0.000000e+00 : f32
    %13 = vector.broadcast %cst_13 : f32 to vector<128x40xf32>
    %14 = arith.maximumf %12, %13 : vector<128x40xf32>
    %15 = arith.truncf %14 : vector<128x40xf32> to vector<128x40xbf16>
    %c48 = arith.constant 48 : index
    %c0_14 = arith.constant 0 : index
    %16 = vector.load %arg4[%c48, %c0_14] : memref<144x40xbf16, #tpu.memory_space<vmem>>, vector<40x40xbf16>
    %cst_15 = arith.constant dense<0.000000e+00> : vector<128x40xf32>
    %17 = tpu.matmul %15, %16, %cst_15 {dimension_numbers = #tpu.dot_dimension_numbers<[1], [0], [0], [1], [0, 0, 1, 1], [], []>} : vector<128x40xbf16>, vector<40x40xbf16>, vector<128x40xf32> -> vector<128x40xf32>
    %c128 = arith.constant 128 : index
    %c0_16 = arith.constant 0 : index
    %18 = vector.load %arg5[%c128, %c0_16] : memref<384x40xf32, #tpu.memory_space<vmem>>, vector<128x40xf32>
    %19 = arith.addf %17, %18 : vector<128x40xf32>
    %cst_17 = arith.constant 0.000000e+00 : f32
    %20 = vector.broadcast %cst_17 : f32 to vector<128x40xf32>
    %21 = arith.maximumf %19, %20 : vector<128x40xf32>
    %22 = arith.truncf %21 : vector<128x40xf32> to vector<128x40xbf16>
    %c96 = arith.constant 96 : index
    %c0_18 = arith.constant 0 : index
    %23 = vector.load %arg4[%c96, %c0_18] : memref<144x40xbf16, #tpu.memory_space<vmem>>, vector<40x40xbf16>
    %cst_19 = arith.constant dense<0.000000e+00> : vector<128x40xf32>
    %24 = tpu.matmul %22, %23, %cst_19 {dimension_numbers = #tpu.dot_dimension_numbers<[1], [0], [0], [1], [0, 0, 1, 1], [], []>} : vector<128x40xbf16>, vector<40x40xbf16>, vector<128x40xf32> -> vector<128x40xf32>
    %c256 = arith.constant 256 : index
    %c0_20 = arith.constant 0 : index
    %25 = vector.load %arg5[%c256, %c0_20] : memref<384x40xf32, #tpu.memory_space<vmem>>, vector<128x40xf32>
    %26 = arith.addf %24, %25 : vector<128x40xf32>
    %27 = vector.extract_strided_slice %26 {offsets = [0, 0], sizes = [128, 2], strides = [1, 1]} : vector<128x40xf32> to vector<128x2xf32>
    %c0_21 = arith.constant 0 : index
    %c0_22 = arith.constant 0 : index
    %28 = vector.load %arg6[%c0_21, %c0_22] : memref<128x2xf32, #tpu.memory_space<vmem>>, vector<128x2xf32>
    tpu.vector_store %arg6[%c0_21, %c0_22], %27 {strides = array<i32>} : memref<128x2xf32, #tpu.memory_space<vmem>>, vector<128x2xf32>,
    return
  }
  func.func @transform_0(%arg0: i32) -> (i32, i32) {
    %c0_i32 = arith.constant 0 : i32
    %c0_i32_0 = arith.constant 0 : i32
    return %arg0, %c0_i32 : i32, i32
  }
  func.func @transform_1(%arg0: i32) -> (i32, i32) {
    %c0_i32 = arith.constant 0 : i32
    %c0_i32_0 = arith.constant 0 : i32
    return %arg0, %c0_i32 : i32, i32
  }
  func.func @transform_2(%arg0: i32) -> (i32, i32) {
    %c0_i32 = arith.constant 0 : i32
    %c0_i32_0 = arith.constant 0 : i32
    return %arg0, %c0_i32 : i32, i32
  }
  func.func @transform_3(%arg0: i32) -> (i32, i32) {
    %c0_i32 = arith.constant 0 : i32
    %c0_i32_0 = arith.constant 0 : i32
    %c0_i32_1 = arith.constant 0 : i32
    return %c0_i32, %c0_i32_0 : i32, i32
  }
  func.func @transform_4(%arg0: i32) -> (i32, i32) {
    %c0_i32 = arith.constant 0 : i32
    %c0_i32_0 = arith.constant 0 : i32
    %c0_i32_1 = arith.constant 0 : i32
    return %c0_i32, %c0_i32_0 : i32, i32
  }
  func.func @transform_5(%arg0: i32) -> (i32, i32) {
    %c0_i32 = arith.constant 0 : i32
    %c0_i32_0 = arith.constant 0 : i32
    return %arg0, %c0_i32 : i32, i32
  }
}

</mosaic_0001>

<bundles_post_ra>
// kernel: manager_critic_forward.1
= control target key start
LH: loop header
LB: loop body
LE: loop exit
PB: predicated region body
PF: predicated region fallthrough
CT: control target
= control target key end

     0   :  { %s1344_s18 = smov 0   ;;  %s1660_s0 = inlined_call_operand.vmem [shape: bf16[256,6], index: 0, kind: input, shape index: {}]   ;;  %s1661_s1 = inlined_call_operand.vmem [shape: bf16[256,3], index: 1, kind: input, shape index: {}]   ;;  %s1662_s2 = inlined_call_operand.vmem [shape: bf16[256,3], index: 2, kind: input, shape index: {}]   ;;  %s1663_s3 = inlined_call_operand.vmem [shape: bf16[144,40], index: 3, kind: input, shape index: {}]   ;;  %s1664_s4 = inlined_call_operand.vmem [shape: f32[384,40], index: 4, kind: input, shape index: {}]   ;;  %s1665_s5 = inlined_call_operand.vmem [shape: f32[256,2], index: 5, kind: output, shape index: {}]  }
   0x1 LB: > { %s1098_s19 = sadd.s32 4294967295, %s1311_s18   ;;  %p1102_p0 = scmp.ge.s32.totalorder %s1311_s18, 1  ;;  %s1311_s18 = sphi %s1344_s18, %s15_s18  }
   0x2   : > { %p210_p1 = scmp.lt.s32.totalorder %s1311_s18, 3 }
   0x4   : > { %p211_p2 = pnand %p1102_p0, %p210_p1 }
   0x5   : > { %s1103_s22 = sshll.u32 (!%p211_p2), %s1098_s19, 4 }
   0x6   : > { %214 = sbr.rel (%p211_p2) target bundleno = 594 (0x252), region = 40  ;;  %p249_p3 = scmp.lt.s32.totalorder (!%p211_p2), %s1103_s22, 31 }
   0xb   : > { %v306_v0 = vld [vmem:[%s1663_s3 + $0x8] sm:$0x3]  ;;  %vm372_vm0 = vcmask 1040384   ;;  %vm373_vm1 = vcmask 1041408   ;;  %v1313_v1 = vmov 65535   ;;  %vm493_vm2 = vcmask 1042432  }
   0xc   : > { %v374_v2 = vsel %vm372_vm0, 4294967295, %v1313_v1  ;;  %v562_v3 = vld [vmem:[%s1663_s3 + $0x10] sm:$0x3]  ;;  %v289_v5 = vld [vmem:[%s1663_s3] sm:$0x7]  ;;  %s1667_s22 = smov (!%p249_p3, %s1103_s22), 31 }
   0xd   : > { %v375_v4 = vsel %vm373_vm1, %v374_v2, 0  ;;  %v495_v8 = vsel %vm493_vm2, %v289_v5, 0  ;;  %s1104_s27 = sshll.u32 %s1667_s22, 2  ;;  %vm347_vm3 = vcmask 23552   ;;  %vm468_vm4 = vcmask 48128   ;;  %v1290_v36 = vld [vmem:[%s1663_s3 + $0x20] sm:$0xff] }
   0xe   : > { %v377_v6 = vand.u32 %v375_v4, %v306_v0  ;;  %v628_v7 = vand.u32 %v562_v3, %v375_v4  ;;  %s1367_s30 = scalar_lea.vmem %s1661_s1, %s1104_s27  ;;  %s1384_s8 = scalar_lea.vmem %s1660_s0, %s1104_s27  ;;  %v755_v29 = vld [vmem:[%s1663_s3 + $0x28] sm:$0xf]  ;;  %vm812_vm5 = vcmask 1043456   ;;  %v1289_v39 = vld [vmem:[%s1663_s3 + $0x18] sm:$0xff]  ;;  %v695_v54 = vld [vmem:[%s1664_s4] sm:$0xff]  ;;  %vm787_vm6 = vcmask 326656  }
   0xf   : > { %v1275_v9 = vld [vmem:[%s1367_s30 + $0x10] sm:$0xff]  ;;  %v1277_v10 = vld [vmem:[%s1367_s30 + $0x20] sm:$0xff]  ;;  %v1276_v12 = vld [vmem:[%s1367_s30 + $0x18] sm:$0xff]  ;;  %s1389_s11 = scalar_lea.vmem %s1662_s2, %s1104_s27  ;;  %v781_v30 = vunpack.c.l.b16 %v755_v29  ;;  %s1110_s20 = sshll.u32 %s1667_s22, 3  ;;  %vm1001_vm7 = vcmask 15360  }
  0x10   : > { %1293 = vmatpush.bf16.msra.mxu1 %v377_v6  ;;  %1294 = vmatpush.bf16.msra.mxu2 %v377_v6  ;;  %v1273_v11 = vld [vmem:[%s1367_s30] sm:$0xff]  ;;  %v1278_v13 = vld [vmem:[%s1367_s30 + $0x28] sm:$0xff]  ;;  %v1267_v19 = vld [vmem:[%s1384_s8 + $0x10] sm:$0xff]  ;;  %s1578_s26 = scalar_lea.vmem %s1665_s5, %s1110_s20 }
  0x11   : > { %386 = vmatpush.bf16.msra.mxu0 %v377_v6  ;;  %1295 = vmatpush.bf16.msra.mxu3 %v377_v6  ;;  %v1274_v14 = vld [vmem:[%s1367_s30 + $0x8] sm:$0xff]  ;;  %v1265_v15 = vld [vmem:[%s1384_s8] sm:$0xff]  ;;  %v1283_v20 = vld [vmem:[%s1389_s11 + $0x10] sm:$0xff]  ;;  %v784_v31 = vpack.c.b16 %v781_v30, %v781_v30 }
  0x12   : > { %v1281_v16 = vld [vmem:[%s1389_s11] sm:$0xff]  ;;  %v1266_v17 = vld [vmem:[%s1384_s8 + $0x8] sm:$0xff]  ;;  %v1268_v21 = vld [vmem:[%s1384_s8 + $0x18] sm:$0xff] }
  0x13   : > { %1145 = vmatmul.msk.bf16.vlgmr.msra.gmra.mxu1 %vm347_vm3, %v1275_v9  ;;  %1147 = vmatmul.msk.bf16.vlgmr.msra.gmra.mxu2 %vm347_vm3, %v1277_v10  ;;  %v1282_v18 = vld [vmem:[%s1389_s11 + $0x8] sm:$0xff]  ;;  %v1284_v22 = vld [vmem:[%s1389_s11 + $0x18] sm:$0xff]  ;;  %v1279_v23 = vld [vmem:[%s1367_s30 + $0x30] sm:$0xff]  ;;  %v814_v32 = vsel %vm812_vm5, %v784_v31, 0 }
  0x14   : > { %637 = vmatpush.bf16.msrb.mxu2 %v628_v7  ;;  %504 = vmatpush.bf16.msrb.mxu1 %v495_v8  ;;  %v1269_v24 = vld [vmem:[%s1384_s8 + $0x20] sm:$0xff]  ;;  %v1280_v26 = vld [vmem:[%s1367_s30 + $0x38] sm:$0xff]  ;;  %v1270_v27 = vld [vmem:[%s1384_s8 + $0x28] sm:$0xff] }
  0x15   : > { %1143 = vmatmul.msk.bf16.vlgmr.msra.gmra.mxu0 %vm347_vm3, %v1273_v11  ;;  %1149 = vmatmul.msk.bf16.vlgmr.msra.gmra.mxu3 %vm347_vm3, %v1279_v23  ;;  %v1285_v25 = vld [vmem:[%s1389_s11 + $0x20] sm:$0xff]  ;;  %v1286_v28 = vld [vmem:[%s1389_s11 + $0x28] sm:$0xff]  ;;  %v1271_v33 = vld [vmem:[%s1384_s8 + $0x30] sm:$0xff] }
  0x16   : > { %821 = vmatpush.bf16.msrb.mxu3 %v814_v32  ;;  %v1287_v34 = vld [vmem:[%s1389_s11 + $0x30] sm:$0xff]  ;;  %v1272_v41 = vld [vmem:[%s1384_s8 + $0x38] sm:$0xff]  ;;  %v696_v57 = vld [vmem:[%s1664_s4 + $0x8] sm:$0xff] }
  0x17   : > { %v1288_v42 = vld [vmem:[%s1389_s11 + $0x38] sm:$0xff]  ;;  %v697_v7 = vld [vmem:[%s1664_s4 + $0x10] sm:$0xff] }
  0x18   : > { %v698_v10 = vld [vmem:[%s1664_s4 + $0x18] sm:$0xff] }
  0x1a   : > { %822 = vmatpush.bf16.msrb.mxu3 %v1290_v36 }
  0x1e   : > { %823 = vmatpush.bf16.msrb.mxu3 %v1289_v39 }
  0x23   : > { %1146 = vmatmul.msk.bf16.gmra.mxu1 %vm347_vm3, %v1276_v12  ;;  %1148 = vmatmul.msk.bf16.gmra.mxu2 %vm347_vm3, %v1278_v13 }
  0x25   : > { %1144 = vmatmul.msk.bf16.gmra.mxu0 %vm347_vm3, %v1274_v14  ;;  %1150 = vmatmul.msk.bf16.gmra.mxu3 %vm347_vm3, %v1280_v26 }
  0x33   : > { %1183 = vmatmul.msk.bf16.vlgmr.msrb.gmra.mxu1 %vm468_vm4, %v1265_v15  ;;  %1223 = vmatmul.msk.bf16.vlgmr.msrb.gmra.mxu2 %vm347_vm3, %v1281_v16 }
  0x43   : > { %1184 = vmatmul.msk.bf16.gmra.mxu1 %vm468_vm4, %v1266_v17  ;;  %1224 = vmatmul.msk.bf16.gmra.mxu2 %vm347_vm3, %v1282_v18 }
  0x53   : > { %1185 = vmatmul.msk.bf16.gmra.mxu1 %vm468_vm4, %v1267_v19  ;;  %1225 = vmatmul.msk.bf16.gmra.mxu2 %vm347_vm3, %v1283_v20 }
  0x63   : > { %1186 = vmatmul.msk.bf16.gmra.mxu1 %vm468_vm4, %v1268_v21  ;;  %1226 = vmatmul.msk.bf16.gmra.mxu2 %vm347_vm3, %v1284_v22  ;;  %v699_v22 = vld [vmem:[%s1664_s4 + $0x20] sm:$0xff] }
  0x73   : > { %1187 = vmatmul.msk.bf16.gmra.mxu1 %vm468_vm4, %v1269_v24  ;;  %1227 = vmatmul.msk.bf16.gmra.mxu2 %vm347_vm3, %v1285_v25  ;;  %v700_v25 = vld [vmem:[%s1664_s4 + $0x28] sm:$0xff] }
  0x83   : > { %1188 = vmatmul.msk.bf16.gmra.mxu1 %vm468_vm4, %v1270_v27  ;;  %1228 = vmatmul.msk.bf16.gmra.mxu2 %vm347_vm3, %v1286_v28 }
  0x90   : > { %v398_v35 = vpop.f32.mrf.mxu1 }
  0x92   : > { %v388_v46 = vpop.f32.mrf.mxu0 }
  0x93   : > { %1189 = vmatmul.msk.bf16.gmra.mxu1 %vm468_vm4, %v1271_v33  ;;  %1229 = vmatmul.msk.bf16.gmra.mxu2 %vm347_vm3, %v1287_v34 }
  0x96   : > { %v1430_v37 = vpop.f32.mrf.mxu2 }
  0x98   : > { %v400_v38 = vpop.f32.mrf.mxu1 }
  0x9a   : > { %v390_v51 = vpop.f32.mrf.mxu0 }
  0x9e   : > { %v1435_v40 = vpop.f32.mrf.mxu2 }
  0xa0   : > { %v403_v43 = vpop.f32.mrf.mxu1 }
  0xa2   : > { %v393_v62 = vpop.f32.mrf.mxu0 }
  0xa3   : > { %1190 = vmatmul.msk.bf16.gmra.mxu1 %vm468_vm4, %v1272_v41  ;;  %1230 = vmatmul.msk.bf16.gmra.mxu2 %vm347_vm3, %v1288_v42  ;;  %v702_v42 = vld [vmem:[%s1664_s4 + $0x38] sm:$0xff] }
  0xa6   : > { %v1441_v44 = vpop.f32.mrf.mxu2 }
  0xa8   : > { %v405_v45 = vpop.f32.mrf.mxu1 }
  0xaa   : > { %v395_v6 = vpop.f32.mrf.mxu0 }
  0xae   : > { %v1443_v47 = vpop.f32.mrf.mxu2 }
  0xb0   : > { %v506_v48 = vpop.f32.mrf.mxu1 }
  0xb1   : > { %v507_v50 = vadd.f32 %v506_v48, %v388_v46 }
  0xb6   : > { %v639_v49 = vpop.f32.mrf.mxu2 }
  0xb7   : > { %v679_v53 = vadd.f32 %v639_v49, %v507_v50 }
  0xb8   : > { %v508_v52 = vpop.f32.mrf.mxu1 }
  0xb9   : > { %v509_v55 = vadd.f32 %v508_v52, %v390_v51  ;;  %v711_v58 = vadd.f32 %v695_v54, %v679_v53 }
  0xbb   : > { %v727_v63 = vmax.f32 %v711_v58, 0.0 }
  0xbe   : > { %v641_v56 = vpop.f32.mrf.mxu2 }
  0xbf   : > { %v680_v59 = vadd.f32 %v641_v56, %v509_v55 }
  0xc0   : > { %v511_v60 = vpop.f32.mrf.mxu1 }
  0xc1   : > { %v712_v61 = vadd.f32 %v696_v57, %v680_v59  ;;  %v512_v3 = vadd.f32 %v511_v60, %v393_v62  ;;  %v704_v59 = vld [vmem:[%s1664_s4 + $0x48] sm:$0xff] }
  0xc3   : > { %v728_v0 = vmax.f32 %v712_v61, 0.0 }
  0xc5   : > { %v743_v1 = vpack.c.bf16 %v728_v0, %v727_v63 }
  0xc6   : > { %v644_v2 = vpop.f32.mrf.mxu2 }
  0xc7   : > { %1239 = vmatmul.msk.bf16.vlgmr.msrb.gmra.mxu3 %vm787_vm6, %v743_v1  ;;  %v681_v5 = vadd.f32 %v644_v2, %v512_v3 }
  0xc8   : > { %v513_v4 = vpop.f32.mrf.mxu1 }
  0xc9   : > { %v514_v8 = vadd.f32 %v513_v4, %v395_v6  ;;  %v713_v11 = vadd.f32 %v697_v7, %v681_v5  ;;  %v418_v7 = vpop.f32.mrf.mxu3 }
  0xcb   : > { %v729_v15 = vmax.f32 %v713_v11, 0.0 }
  0xce   : > { %v646_v9 = vpop.f32.mrf.mxu2 }
  0xcf   : > { %v682_v12 = vadd.f32 %v646_v9, %v514_v8  ;;  %v706_v9 = vld [vmem:[%s1664_s4 + $0x58] sm:$0xff] }
  0xd0   : > { %v516_v13 = vpop.f32.mrf.mxu1 }
  0xd1   : > { %v714_v14 = vadd.f32 %v698_v10, %v682_v12  ;;  %v517_v20 = vadd.f32 %v516_v13, %v398_v35 }
  0xd3   : > { %v730_v16 = vmax.f32 %v714_v14, 0.0 }
  0xd5   : > { %v744_v17 = vpack.c.bf16 %v730_v16, %v729_v15 }
  0xd6   : > { %v649_v18 = vpop.f32.mrf.mxu2 }
  0xd7   : > { %1240 = vmatmul.msk.bf16.gmra.mxu3 %vm787_vm6, %v744_v17  ;;  %v683_v21 = vadd.f32 %v649_v18, %v517_v20  ;;  %v420_v18 = vpop.f32.mrf.mxu3 }
  0xd8   : > { %v518_v19 = vpop.f32.mrf.mxu1 }
  0xd9   : > { %v519_v23 = vadd.f32 %v518_v19, %v400_v38  ;;  %v715_v26 = vadd.f32 %v699_v22, %v683_v21  ;;  %v701_v38 = vld [vmem:[%s1664_s4 + $0x30] sm:$0xff] }
  0xdb   : > { %v731_v30 = vmax.f32 %v715_v26, 0.0  ;;  %v1292_v26 = vld [vmem:[%s1663_s3 + $0x38] sm:$0xff] }
  0xde   : > { %v651_v24 = vpop.f32.mrf.mxu2 }
  0xdf   : > { %v684_v27 = vadd.f32 %v651_v24, %v519_v23  ;;  %v707_v23 = vld [vmem:[%s1664_s4 + $0x60] sm:$0xff] }
  0xe0   : > { %v521_v28 = vpop.f32.mrf.mxu1 }
  0xe1   : > { %v716_v29 = vadd.f32 %v700_v25, %v684_v27  ;;  %v522_v35 = vadd.f32 %v521_v28, %v403_v43  ;;  %v708_v28 = vld [vmem:[%s1664_s4 + $0x68] sm:$0xff] }
  0xe3   : > { %v732_v31 = vmax.f32 %v716_v29, 0.0 }
  0xe5   : > { %v745_v32 = vpack.c.bf16 %v732_v31, %v731_v30 }
  0xe6   : > { %v654_v33 = vpop.f32.mrf.mxu2 }
  0xe7   : > { %1241 = vmatmul.msk.bf16.gmra.mxu3 %vm787_vm6, %v745_v32  ;;  %v685_v36 = vadd.f32 %v654_v33, %v522_v35  ;;  %v423_v33 = vpop.f32.mrf.mxu3 }
  0xe8   : > { %v523_v34 = vpop.f32.mrf.mxu1 }
  0xe9   : > { %v524_v39 = vadd.f32 %v523_v34, %v405_v45  ;;  %v717_v46 = vadd.f32 %v701_v38, %v685_v36  ;;  %v703_v45 = vld [vmem:[%s1664_s4 + $0x40] sm:$0xff] }
  0xeb   : > { %v733_v51 = vmax.f32 %v717_v46, 0.0 }
  0xee   : > { %v656_v41 = vpop.f32.mrf.mxu2 }
  0xef   : > { %v686_v48 = vadd.f32 %v656_v41, %v524_v39  ;;  %v425_v46 = vpop.f32.mrf.mxu3 }
  0xf0   : > { %v526_v49 = vpop.f32.mrf.mxu1 }
  0xf1   : > { %v718_v50 = vadd.f32 %v702_v42, %v686_v48  ;;  %v527_v55 = vadd.f32 %v526_v49, %v1430_v37  ;;  %v709_v48 = vld [vmem:[%s1664_s4 + $0x70] sm:$0xff] }
  0xf3   : > { %v734_v52 = vmax.f32 %v718_v50, 0.0  ;;  %v1291_v50 = vld [vmem:[%s1663_s3 + $0x30] sm:$0xff] }
  0xf5   : > { %v746_v53 = vpack.c.bf16 %v734_v52, %v733_v51  ;;  %v710_v52 = vld [vmem:[%s1664_s4 + $0x78] sm:$0xff] }
  0xf6   : > { %v659_v54 = vpop.f32.mrf.mxu2 }
  0xf7   : > { %1242 = vmatmul.msk.bf16.gmra.mxu3 %vm787_vm6, %v746_v53  ;;  %v687_v56 = vadd.f32 %v659_v54, %v527_v55 }
  0xf8   : > { %v528_v43 = vpop.f32.mrf.mxu1 }
  0xf9   : > { %v529_v57 = vadd.f32 %v528_v43, %v1435_v40  ;;  %v719_v60 = vadd.f32 %v703_v45, %v687_v56  ;;  %v705_v40 = vld [vmem:[%s1664_s4 + $0x50] sm:$0xff] }
  0xfb   : > { %v735_v0 = vmax.f32 %v719_v60, 0.0 }
  0xfe   : > { %v661_v58 = vpop.f32.mrf.mxu2 }
  0xff   : > { %v688_v61 = vadd.f32 %v661_v58, %v529_v57  ;;  %v756_v58 = vld [vmem:[%s1664_s4 + $0x80] sm:$0xff] }
 0x100   : > { %v531_v62 = vpop.f32.mrf.mxu1 }
 0x101   : > { %v720_v63 = vadd.f32 %v704_v59, %v688_v61  ;;  %v532_v4 = vadd.f32 %v531_v62, %v1441_v44  ;;  %v757_v59 = vld [vmem:[%s1664_s4 + $0x88] sm:$0xff] }
 0x103   : > { %v736_v1 = vmax.f32 %v720_v63, 0.0 }
 0x105   : > { %v747_v2 = vpack.c.bf16 %v736_v1, %v735_v0 }
 0x106   : > { %v664_v37 = vpop.f32.mrf.mxu2 }
 0x107   : > { %1243 = vmatmul.msk.bf16.gmra.mxu3 %vm787_vm6, %v747_v2  ;;  %v689_v5 = vadd.f32 %v664_v37, %v532_v4  ;;  %v758_v37 = vld [vmem:[%s1664_s4 + $0x90] sm:$0xff] }
 0x108   : > { %v533_v3 = vpop.f32.mrf.mxu1 }
 0x109   : > { %v534_v6 = vadd.f32 %v533_v3, %v1443_v47  ;;  %v721_v10 = vadd.f32 %v705_v40, %v689_v5  ;;  %v893_v47 = vld [vmem:[%s1663_s3 + $0x40] sm:$0xf]  ;;  %v759_v3 = vld [vmem:[%s1664_s4 + $0x98] sm:$0xff] }
 0x10a   : > { %v919_v20 = vunpack.c.l.b16 %v893_v47  ;;  %v762_v47 = vld [vmem:[%s1664_s4 + $0xb0] sm:$0xff] }
 0x10b   : > { %v737_v14 = vmax.f32 %v721_v10, 0.0  ;;  %v760_v10 = vld [vmem:[%s1664_s4 + $0xa0] sm:$0xff] }
 0x10c   : > { %v922_v21 = vpack.c.b16 %v919_v20, %v919_v20 }
 0x10e   : > { %v666_v8 = vpop.f32.mrf.mxu2  ;;  %v950_v24 = vsel %vm812_vm5, %v922_v21, 0 }
 0x10f   : > { %v690_v11 = vadd.f32 %v666_v8, %v534_v6  ;;  %957 = vmatpush.bf16.msrb.mxu0 %v950_v24 }
 0x110   : > { %v536_v12 = vpop.f32.mrf.mxu1 }
 0x111   : > { %v722_v13 = vadd.f32 %v706_v9, %v690_v11  ;;  %v537_v17 = vadd.f32 %v536_v12, %v418_v7  ;;  %v761_v11 = vld [vmem:[%s1664_s4 + $0xa8] sm:$0xff] }
 0x113   : > { %v738_v15 = vmax.f32 %v722_v13, 0.0  ;;  %958 = vmatpush.bf16.msrb.mxu0 %v1292_v26  ;;  %v764_v26 = vld [vmem:[%s1664_s4 + $0xc0] sm:$0xff] }
 0x115   : > { %v748_v44 = vpack.c.bf16 %v738_v15, %v737_v14 }
 0x116   : > { %v669_v16 = vpop.f32.mrf.mxu2 }
 0x117   : > { %1244 = vmatmul.msk.bf16.gmra.mxu3 %vm787_vm6, %v748_v44  ;;  %v691_v22 = vadd.f32 %v669_v16, %v537_v17  ;;  %959 = vmatpush.bf16.msrb.mxu0 %v1291_v50  ;;  %v768_v50 = vld [vmem:[%s1664_s4 + $0xe0] sm:$0xff] }
 0x118   : > { %v538_v19 = vpop.f32.mrf.mxu1 }
 0x119   : > { %v539_v25 = vadd.f32 %v538_v19, %v420_v18  ;;  %v723_v29 = vadd.f32 %v707_v23, %v691_v22  ;;  %v763_v18 = vld [vmem:[%s1664_s4 + $0xb8] sm:$0xff] }
 0x11b   : > { %v739_v34 = vmax.f32 %v723_v29, 0.0 }
 0x11e   : > { %v671_v27 = vpop.f32.mrf.mxu2 }
 0x11f   : > { %v692_v30 = vadd.f32 %v671_v27, %v539_v25  ;;  %v765_v27 = vld [vmem:[%s1664_s4 + $0xc8] sm:$0xff] }
 0x120   : > { %v541_v31 = vpop.f32.mrf.mxu1 }
 0x121   : > { %v724_v32 = vadd.f32 %v708_v28, %v692_v30  ;;  %v542_v39 = vadd.f32 %v541_v31, %v423_v33 }
 0x123   : > { %v740_v35 = vmax.f32 %v724_v32, 0.0 }
 0x125   : > { %v749_v36 = vpack.c.bf16 %v740_v35, %v739_v34  ;;  %v766_v35 = vld [vmem:[%s1664_s4 + $0xd0] sm:$0xff] }
 0x126   : > { %v674_v38 = vpop.f32.mrf.mxu2 }
 0x127   : > { %1245 = vmatmul.msk.bf16.gmra.mxu3 %vm787_vm6, %v749_v36  ;;  %v693_v42 = vadd.f32 %v674_v38, %v542_v39  ;;  %v767_v36 = vld [vmem:[%s1664_s4 + $0xd8] sm:$0xff] }
 0x128   : > { %v543_v41 = vpop.f32.mrf.mxu1 }
 0x129   : > { %v544_v49 = vadd.f32 %v543_v41, %v425_v46  ;;  %v725_v53 = vadd.f32 %v709_v48, %v693_v42 }
 0x12b   : > { %v741_v55 = vmax.f32 %v725_v53, 0.0 }
 0x12e   : > { %v676_v51 = vpop.f32.mrf.mxu2 }
 0x12f   : > { %v694_v54 = vadd.f32 %v676_v51, %v544_v49  ;;  %v769_v51 = vld [vmem:[%s1664_s4 + $0xe8] sm:$0xff] }
 0x131   : > { %v726_v43 = vadd.f32 %v710_v52, %v694_v54 }
 0x133   : > { %v742_v56 = vmax.f32 %v726_v43, 0.0 }
 0x135   : > { %v750_v45 = vpack.c.bf16 %v742_v56, %v741_v55 }
 0x137   : > { %1246 = vmatmul.msk.bf16.gmra.mxu3 %vm787_vm6, %v750_v45 }
 0x14a   : > { %v825_v57 = vpop.f32.mrf.mxu3 }
 0x14b   : > { %v826_v60 = vadd.f32 %v825_v57, %v756_v58  ;;  %v770_v57 = vld [vmem:[%s1664_s4 + $0xf0] sm:$0xff]  ;;  %v771_v58 = vld [vmem:[%s1664_s4 + $0xf8] sm:$0xff] }
 0x14d   : > { %v865_v63 = vmax.f32 %v826_v60, 0.0 }
 0x152   : > { %v827_v61 = vpop.f32.mrf.mxu3 }
 0x153   : > { %v828_v62 = vadd.f32 %v827_v61, %v757_v59 }
 0x155   : > { %v866_v0 = vmax.f32 %v828_v62, 0.0 }
 0x157   : > { %v881_v1 = vpack.c.bf16 %v866_v0, %v865_v63 }
 0x159   : > { %1255 = vmatmul.msk.bf16.vlgmr.msrb.gmra.mxu0 %vm787_vm6, %v881_v1  ;;  %v894_v1 = vld [vmem:[%s1664_s4 + $0x100] sm:$0xff] }
 0x15a   : > { %v830_v2 = vpop.f32.mrf.mxu3 }
 0x15b   : > { %v831_v4 = vadd.f32 %v830_v2, %v758_v37 }
 0x15d   : > { %v867_v6 = vmax.f32 %v831_v4, 0.0 }
 0x162   : > { %v832_v5 = vpop.f32.mrf.mxu3 }
 0x163   : > { %v833_v40 = vadd.f32 %v832_v5, %v759_v3  ;;  %v895_v3 = vld [vmem:[%s1664_s4 + $0x108] sm:$0xff] }
 0x165   : > { %v868_v7 = vmax.f32 %v833_v40, 0.0  ;;  %v896_v40 = vld [vmem:[%s1664_s4 + $0x110] sm:$0xff] }
 0x167   : > { %v882_v8 = vpack.c.bf16 %v868_v7, %v867_v6 }
 0x169   : > { %1256 = vmatmul.msk.bf16.gmra.mxu0 %vm787_vm6, %v882_v8  ;;  %v897_v8 = vld [vmem:[%s1664_s4 + $0x118] sm:$0xff] }
 0x16a   : > { %v835_v9 = vpop.f32.mrf.mxu3 }
 0x16b   : > { %v836_v12 = vadd.f32 %v835_v9, %v760_v10 }
 0x16d   : > { %v869_v15 = vmax.f32 %v836_v12, 0.0 }
 0x172   : > { %v837_v13 = vpop.f32.mrf.mxu3 }
 0x173   : > { %v838_v14 = vadd.f32 %v837_v13, %v761_v11  ;;  %v898_v11 = vld [vmem:[%s1664_s4 + $0x120] sm:$0xff] }
 0x175   : > { %v870_v44 = vmax.f32 %v838_v14, 0.0  ;;  %v899_v14 = vld [vmem:[%s1664_s4 + $0x128] sm:$0xff] }
 0x177   : > { %v883_v16 = vpack.c.bf16 %v870_v44, %v869_v15 }
 0x179   : > { %1257 = vmatmul.msk.bf16.gmra.mxu0 %vm787_vm6, %v883_v16  ;;  %v900_v16 = vld [vmem:[%s1664_s4 + $0x130] sm:$0xff] }
 0x17a   : > { %v840_v17 = vpop.f32.mrf.mxu3 }
 0x17b   : > { %v841_v19 = vadd.f32 %v840_v17, %v762_v47 }
 0x17d   : > { %v871_v22 = vmax.f32 %v841_v19, 0.0 }
 0x182   : > { %v842_v20 = vpop.f32.mrf.mxu3 }
 0x183   : > { %v843_v21 = vadd.f32 %v842_v20, %v763_v18  ;;  %v901_v18 = vld [vmem:[%s1664_s4 + $0x138] sm:$0xff] }
 0x185   : > { %v872_v23 = vmax.f32 %v843_v21, 0.0  ;;  %v902_v21 = vld [vmem:[%s1664_s4 + $0x140] sm:$0xff] }
 0x187   : > { %v884_v24 = vpack.c.bf16 %v872_v23, %v871_v22 }
 0x189   : > { %1258 = vmatmul.msk.bf16.gmra.mxu0 %vm787_vm6, %v884_v24  ;;  %v903_v24 = vld [vmem:[%s1664_s4 + $0x148] sm:$0xff] }
 0x18a   : > { %v845_v25 = vpop.f32.mrf.mxu3 }
 0x18b   : > { %v846_v28 = vadd.f32 %v845_v25, %v764_v26 }
 0x18d   : > { %v873_v31 = vmax.f32 %v846_v28, 0.0 }
 0x192   : > { %v847_v29 = vpop.f32.mrf.mxu3 }
 0x193   : > { %v848_v30 = vadd.f32 %v847_v29, %v765_v27  ;;  %v904_v27 = vld [vmem:[%s1664_s4 + $0x150] sm:$0xff] }
 0x195   : > { %v874_v32 = vmax.f32 %v848_v30, 0.0  ;;  %v905_v30 = vld [vmem:[%s1664_s4 + $0x158] sm:$0xff] }
 0x197   : > { %v885_v33 = vpack.c.bf16 %v874_v32, %v873_v31 }
 0x199   : > { %1259 = vmatmul.msk.bf16.gmra.mxu0 %vm787_vm6, %v885_v33  ;;  %v906_v33 = vld [vmem:[%s1664_s4 + $0x160] sm:$0xff] }
 0x19a   : > { %v850_v34 = vpop.f32.mrf.mxu3 }
 0x19b   : > { %v851_v38 = vadd.f32 %v850_v34, %v766_v35 }
 0x19d   : > { %v875_v42 = vmax.f32 %v851_v38, 0.0 }
 0x1a2   : > { %v852_v39 = vpop.f32.mrf.mxu3 }
 0x1a3   : > { %v853_v41 = vadd.f32 %v852_v39, %v767_v36  ;;  %v907_v36 = vld [vmem:[%s1664_s4 + $0x168] sm:$0xff] }
 0x1a5   : > { %v876_v46 = vmax.f32 %v853_v41, 0.0  ;;  %v908_v41 = vld [vmem:[%s1664_s4 + $0x170] sm:$0xff] }
 0x1a7   : > { %v886_v48 = vpack.c.bf16 %v876_v46, %v875_v42 }
 0x1a9   : > { %1260 = vmatmul.msk.bf16.gmra.mxu0 %vm787_vm6, %v886_v48  ;;  %v909_v48 = vld [vmem:[%s1664_s4 + $0x178] sm:$0xff] }
 0x1aa   : > { %v855_v49 = vpop.f32.mrf.mxu3 }
 0x1ab   : > { %v856_v52 = vadd.f32 %v855_v49, %v768_v50 }
 0x1ad   : > { %v877_v43 = vmax.f32 %v856_v52, 0.0 }
 0x1b2   : > { %v857_v53 = vpop.f32.mrf.mxu3 }
 0x1b3   : > { %v858_v54 = vadd.f32 %v857_v53, %v769_v51 }
 0x1b5   : > { %v878_v55 = vmax.f32 %v858_v54, 0.0 }
 0x1b7   : > { %v887_v56 = vpack.c.bf16 %v878_v55, %v877_v43 }
 0x1b9   : > { %1261 = vmatmul.msk.bf16.gmra.mxu0 %vm787_vm6, %v887_v56 }
 0x1ba   : > { %v860_v45 = vpop.f32.mrf.mxu3 }
 0x1bb   : > { %v861_v59 = vadd.f32 %v860_v45, %v770_v57 }
 0x1bd   : > { %v879_v62 = vmax.f32 %v861_v59, 0.0 }
 0x1c2   : > { %v862_v60 = vpop.f32.mrf.mxu3 }
 0x1c3   : > { %v863_v61 = vadd.f32 %v862_v60, %v771_v58 }
 0x1c5   : > { %v880_v63 = vmax.f32 %v863_v61, 0.0 }
 0x1c7   : > { %v888_v0 = vpack.c.bf16 %v880_v63, %v879_v62 }
 0x1c9   : > { %1262 = vmatmul.msk.bf16.gmra.mxu0 %vm787_vm6, %v888_v0 }
 0x1d6   : > { %v961_v2 = vpop.f32.mrf.mxu0 }
 0x1d7   : > { %v962_v37 = vadd.f32 %v961_v2, %v894_v1 }
 0x1d9   : > { %1002 = vst.msk [vmem:[%s1578_s26] sm:$0xff] %vm1001_vm7, %v962_v37 }
 0x1de   : > { %v963_v4 = vpop.f32.mrf.mxu0 }
 0x1df   : > { %v964_v5 = vadd.f32 %v963_v4, %v895_v3 }
 0x1e1   : > { %1003 = vst.msk [vmem:[%s1578_s26 + $0x8] sm:$0xff] %vm1001_vm7, %v964_v5 }
 0x1e6   : > { %v966_v6 = vpop.f32.mrf.mxu0 }
 0x1e7   : > { %v967_v7 = vadd.f32 %v966_v6, %v896_v40 }
 0x1e9   : > { %1004 = vst.msk [vmem:[%s1578_s26 + $0x10] sm:$0xff] %vm1001_vm7, %v967_v7 }
 0x1ee   : > { %v968_v9 = vpop.f32.mrf.mxu0 }
 0x1ef   : > { %v969_v10 = vadd.f32 %v968_v9, %v897_v8 }
 0x1f1   : > { %1005 = vst.msk [vmem:[%s1578_s26 + $0x18] sm:$0xff] %vm1001_vm7, %v969_v10 }
 0x1f6   : > { %v971_v12 = vpop.f32.mrf.mxu0 }
 0x1f7   : > { %v972_v13 = vadd.f32 %v971_v12, %v898_v11 }
 0x1f9   : > { %1006 = vst.msk [vmem:[%s1578_s26 + $0x20] sm:$0xff] %vm1001_vm7, %v972_v13 }
 0x1fe   : > { %v973_v15 = vpop.f32.mrf.mxu0 }
 0x1ff   : > { %v974_v44 = vadd.f32 %v973_v15, %v899_v14 }
 0x201   : > { %1007 = vst.msk [vmem:[%s1578_s26 + $0x28] sm:$0xff] %vm1001_vm7, %v974_v44 }
 0x206   : > { %v976_v17 = vpop.f32.mrf.mxu0 }
 0x207   : > { %v977_v47 = vadd.f32 %v976_v17, %v900_v16 }
 0x209   : > { %1008 = vst.msk [vmem:[%s1578_s26 + $0x30] sm:$0xff] %vm1001_vm7, %v977_v47 }
 0x20e   : > { %v978_v19 = vpop.f32.mrf.mxu0 }
 0x20f   : > { %v979_v20 = vadd.f32 %v978_v19, %v901_v18 }
 0x211   : > { %1009 = vst.msk [vmem:[%s1578_s26 + $0x38] sm:$0xff] %vm1001_vm7, %v979_v20 }
 0x216   : > { %v981_v22 = vpop.f32.mrf.mxu0 }
 0x217   : > { %v982_v23 = vadd.f32 %v981_v22, %v902_v21 }
 0x219   : > { %1010 = vst.msk [vmem:[%s1578_s26 + $0x40] sm:$0xff] %vm1001_vm7, %v982_v23 }
 0x21e   : > { %v983_v25 = vpop.f32.mrf.mxu0 }
 0x21f   : > { %v984_v26 = vadd.f32 %v983_v25, %v903_v24 }
 0x221   : > { %1011 = vst.msk [vmem:[%s1578_s26 + $0x48] sm:$0xff] %vm1001_vm7, %v984_v26 }
 0x226   : > { %v986_v28 = vpop.f32.mrf.mxu0 }
 0x227   : > { %v987_v29 = vadd.f32 %v986_v28, %v904_v27 }
 0x229   : > { %1012 = vst.msk [vmem:[%s1578_s26 + $0x50] sm:$0xff] %vm1001_vm7, %v987_v29 }
 0x22e   : > { %v988_v31 = vpop.f32.mrf.mxu0 }
 0x22f   : > { %v989_v32 = vadd.f32 %v988_v31, %v905_v30 }
 0x231   : > { %1013 = vst.msk [vmem:[%s1578_s26 + $0x58] sm:$0xff] %vm1001_vm7, %v989_v32 }
 0x236   : > { %v991_v34 = vpop.f32.mrf.mxu0 }
 0x237   : > { %v992_v35 = vadd.f32 %v991_v34, %v906_v33 }
 0x239   : > { %1014 = vst.msk [vmem:[%s1578_s26 + $0x60] sm:$0xff] %vm1001_vm7, %v992_v35 }
 0x23e   : > { %v993_v38 = vpop.f32.mrf.mxu0 }
 0x23f   : > { %v994_v39 = vadd.f32 %v993_v38, %v907_v36 }
 0x241   : > { %1015 = vst.msk [vmem:[%s1578_s26 + $0x68] sm:$0xff] %vm1001_vm7, %v994_v39 }
 0x246   : > { %v996_v42 = vpop.f32.mrf.mxu0 }
 0x247   : > { %v997_v46 = vadd.f32 %v996_v42, %v908_v41 }
 0x249   : > { %1016 = vst.msk [vmem:[%s1578_s26 + $0x70] sm:$0xff] %vm1001_vm7, %v997_v46 }
 0x24e   : > { %v998_v49 = vpop.f32.mrf.mxu0 }
 0x24f   : > { %v999_v50 = vadd.f32 %v998_v49, %v909_v48 }
 0x251   : > { %1017 = vst.msk [vmem:[%s1578_s26 + $0x78] sm:$0xff] %vm1001_vm7, %v999_v50 }
 0x252 PF: > { %s15_s18 = sadd.s32 1, %s1311_s18  }
 0x253   : > { %p12_p4 = scmp.ge.s32.totalorder %s15_s18, 4  }
 0x255   :  { %14 = sbr.rel (!%p12_p4) target bundleno = 1 (0x1), region = 76 }

</bundles_post_ra>
